<compile_context>
chip_gen: v7x
topology: tpu7x:2x2x1
jax: 0.10.0
libtpu: 0.0.40
codegen_flags: <defaults>
</compile_context>

<pallas_src>
import functools

import jax
import jax.numpy as jnp
import numpy as np
from jax.experimental import pallas as pl
from jax.experimental.pallas import tpu as pltpu


# ----------------------------------------------------------------------------
# Table construction (registered-buffer equivalents -- plain NumPy glue)
# ----------------------------------------------------------------------------
def make_sinusoid_table(n_position: int, d_hid: int) -> jnp.ndarray:
    """Replicates PositionalEncoder._get_sinusoid_encoding_table."""
    pos = np.arange(n_position, dtype=np.float64)[:, None]           # (P, 1)
    hid = np.arange(d_hid, dtype=np.float64)[None, :]                 # (1, D)
    angle = pos / np.power(10000.0, 2.0 * (hid // 2) / d_hid)         # (P, D)
    table = np.empty((n_position, d_hid), dtype=np.float64)
    table[:, 0::2] = np.sin(angle[:, 0::2])
    table[:, 1::2] = np.cos(angle[:, 1::2])
    return jnp.asarray(table[None, :, :], dtype=jnp.float32)          # (1, P, D)


def make_ramp_table(n_position: int) -> jnp.ndarray:
    """Replicates PositionalEncoder._get_table (r=True).  Used here only to
    build the pure-JAX reference; the kernel generates the ramp in-kernel."""
    table = np.arange(n_position, dtype=np.float64) / n_position
    return jnp.asarray(table[None, :, None], dtype=jnp.float32)       # (1, P, 1)


# ----------------------------------------------------------------------------
# Kernels
# ----------------------------------------------------------------------------
def _add_kernel(x_ref, tbl_ref, o_ref):
    # x_ref/o_ref: (tB, tP, D); tbl_ref: (1, tP, D).  Broadcast over batch on
    # the VPU; add in the promoted dtype, store in x's dtype.
    o_ref[...] = (x_ref[...] + tbl_ref[...]).astype(o_ref.dtype)


def _mul_kernel(x_ref, o_ref, *, tile_p, n_position):
    # x_ref/o_ref: (tB, tP, D).  Ramp (row / n_position) generated in-kernel
    # from an iota -- no table input stream.
    tp = x_ref.shape[1]
    row0 = (pl.program_id(0) * tile_p).astype(jnp.float32)
    rows = jax.lax.broadcasted_iota(jnp.int32, (1, tp, 1), 1).astype(jnp.float32)
    ramp = (rows + row0) / jnp.float32(n_position)                    # (1, tP, 1)
    o_ref[...] = (x_ref[...] * ramp).astype(o_ref.dtype)


def _mul_small_kernel(x_ref, o_ref, *, n_position):
    # Whole-array (no grid) variant of _mul_kernel.
    p = x_ref.shape[1]
    rows = jax.lax.broadcasted_iota(jnp.int32, (1, p, 1), 1).astype(jnp.float32)
    ramp = rows / jnp.float32(n_position)
    o_ref[...] = (x_ref[...] * ramp).astype(o_ref.dtype)


# ----------------------------------------------------------------------------
# Tiling policy
# ----------------------------------------------------------------------------
_TILE_BYTE_BUDGET = 2 << 20    # ~2 MiB per (tB, tP, D) block
_SMALL_TOTAL_BYTES = 2 << 20   # <= this much x -> single un-gridded call
_TILED_VMEM_LIMIT = 32 << 20   # explicit scoped-VMEM limit for the tiled path
                               # (v5e default is 16 MiB; v7x physical is 64 MiB)


def _sublane(dtype) -> int:
    # f32 -> 8, bf16 -> 16, int8/fp8 -> 32 sublane packing.
    return max(8, 32 // jnp.dtype(dtype).itemsize)


def _pick_tile(extent: int, limit: int, align: int) -> int:
    """Largest tile that respects `limit`, is a multiple of `align` (or the
    full extent), preferring exact divisors of `extent`.  Never returns a tile
    larger than the extent; never falls back to an over-budget whole axis."""
    if extent <= limit or extent <= align:
        return extent
    cap = max(align, (min(limit, extent) // align) * align)
    for cand in range(cap, align - 1, -align):
        if extent % cand == 0:
            return cand           # aligned divisor -> exact grid
    return cap                    # aligned non-divisor -> cdiv grid + edge masking


def _choose_tiles(B: int, P: int, D: int, dtype, budget: int):
    sub = _sublane(dtype)
    itemsize = jnp.dtype(dtype).itemsize
    row_bytes = D * itemsize
    max_rows = max(1, budget // row_bytes)
    tP = _pick_tile(P, max_rows, sub)
    max_batch = max(1, budget // (tP * row_bytes))
    tB = _pick_tile(B, max_batch, 1)

    # Guarantee a handful of grid points so both of v7x's TensorCores get
    # work (harmless on single-core v5e/v6e).
    def _points(tb, tp):
        return pl.cdiv(B, tb) * pl.cdiv(P, tp)

    while _points(tB, tP) < 4:
        if tB > 1:
            tB = max(1, tB // 2)
        elif tP >= 2 * sub:
            tP = max(sub, ((tP // 2) // sub) * sub)
        else:
            break
    return tB, tP


# ----------------------------------------------------------------------------
# Wrapper
# ----------------------------------------------------------------------------
def positional_encoder(x: jnp.ndarray, pos_table: jnp.ndarray = None, *, r: bool = False):
    """Forward pass of PositionalEncoder.

    x:         (B, n_position, d_hid)
    pos_table: (1, n_position, d_hid) sinusoid table, required when r=False.
               When r=True the module's ramp table (i / n_position) is
               generated inside the kernel, so no table is needed.
    """
    B, P, D = x.shape
    itemsize = jnp.dtype(x.dtype).itemsize
    out_shape = jax.ShapeDtypeStruct((B, P, D), x.dtype)

    # --- tiny inputs: one un-gridded call, whole arrays in VMEM -------------
    if B * P * D * itemsize <= _SMALL_TOTAL_BYTES:
        vmem_spec = pl.BlockSpec(memory_space=pltpu.MemorySpace.VMEM)
        if r:
            return pl.pallas_call(
                functools.partial(_mul_small_kernel, n_position=P),
                out_shape=out_shape,
                in_specs=[vmem_spec],
                out_specs=vmem_spec,
            )(x)
        assert pos_table is not None and pos_table.shape == (1, P, D)
        return pl.pallas_call(
            _add_kernel,
            out_shape=out_shape,
            in_specs=[vmem_spec, vmem_spec],
            out_specs=vmem_spec,
        )(x, pos_table)

    # --- larger inputs: (tB, tP, D) blocks, table resident over batch -------
    tB, tP = _choose_tiles(B, P, D, x.dtype, _TILE_BYTE_BUDGET)
    grid = (pl.cdiv(P, tP), pl.cdiv(B, tB))        # P slow, B fast
    x_spec = pl.BlockSpec((tB, tP, D), lambda p, b: (b, p, 0))
    out_spec = pl.BlockSpec((tB, tP, D), lambda p, b: (b, p, 0))
    params = pltpu.CompilerParams(
        dimension_semantics=("parallel", "parallel"),
        vmem_limit_bytes=_TILED_VMEM_LIMIT,
    )

    if r:
        return pl.pallas_call(
            functools.partial(_mul_kernel, tile_p=tP, n_position=P),
            out_shape=out_shape,
            grid_spec=pltpu.PrefetchScalarGridSpec(
                num_scalar_prefetch=0,
                grid=grid,
                in_specs=[x_spec],
                out_specs=out_spec,
            ),
            compiler_params=params,
        )(x)

    assert pos_table is not None and pos_table.shape == (1, P, D)
    tbl_spec = pl.BlockSpec((1, tP, D), lambda p, b: (0, p, 0))   # b-invariant
    return pl.pallas_call(
        _add_kernel,
        out_shape=out_shape,
        grid_spec=pltpu.PrefetchScalarGridSpec(
            num_scalar_prefetch=0,
            grid=grid,
            in_specs=[x_spec, tbl_spec],
            out_specs=out_spec,
        ),
        compiler_params=params,
    )(x, pos_table)


# ----------------------------------------------------------------------------
# Main
# ----------------------------------------------------------------------------
if __name__ == "__main__":
    # Module-default shapes (d_hid=128, n_position=24) -> tiny whole-array path.
    d_hid, n_position, batch = 128, 24, 2
    key = jax.random.PRNGKey(0)
    x = jax.random.normal(key, (batch, n_position, d_hid), dtype=jnp.float32)

    sin_table = make_sinusoid_table(n_position, d_hid)
    ramp_table = make_ramp_table(n_position)

    ref_add = x + sin_table
    ref_mul = x * ramp_table

    out_add = jax.block_until_ready(positional_encoder(x, sin_table, r=False))
    assert jnp.allclose(out_add, ref_add, atol=1e-6), "add path mismatch (small)"

    out_mul = jax.block_until_ready(positional_encoder(x, r=True))
    assert jnp.allclose(out_mul, ref_mul, atol=1e-6), "mul path mismatch (small)"

    # Larger shape (~3 MiB) to exercise the tiled (P_tiles, B_tiles) path.
    B2, P2, D2 = 6, 1024, 128
    x2 = jax.random.normal(jax.random.PRNGKey(1), (B2, P2, D2), dtype=jnp.float32)
    t2_add = make_sinusoid_table(P2, D2)
    ref2_add = x2 + t2_add
    ref2_mul = x2 * make_ramp_table(P2)

    out2_add = jax.block_until_ready(positional_encoder(x2, t2_add, r=False))
    assert jnp.allclose(out2_add, ref2_add, atol=1e-6), "add path mismatch (tiled)"

    out2_mul = jax.block_until_ready(positional_encoder(x2, r=True))
    assert jnp.allclose(out2_mul, ref2_mul, atol=1e-6), "mul path mismatch (tiled)"

    print("KERNEL_OK")
</pallas_src>

<mosaic_0001>
module attributes {stable_mosaic.version = 11 : i64} {
  func.func @_add_kernel(%arg0: memref<2x24x128xf32, #tpu.memory_space<vmem>>, %arg1: memref<1x24x128xf32, #tpu.memory_space<vmem>>, %arg2: memref<2x24x128xf32, #tpu.memory_space<vmem>>) attributes {dimension_semantics = [], scalar_prefetch = 0 : i64, scratch_operands = 0 : i64, tpu.core_type = #tpu.core_type<tc>} {
    %c0 = arith.constant 0 : index
    %c0_0 = arith.constant 0 : index
    %c0_1 = arith.constant 0 : index
    %0 = vector.load %arg0[%c0, %c0_0, %c0_1] : memref<2x24x128xf32, #tpu.memory_space<vmem>>, vector<2x24x128xf32>
    %c0_2 = arith.constant 0 : index
    %c0_3 = arith.constant 0 : index
    %c0_4 = arith.constant 0 : index
    %1 = vector.load %arg1[%c0_2, %c0_3, %c0_4] : memref<1x24x128xf32, #tpu.memory_space<vmem>>, vector<1x24x128xf32>
    %2 = vector.broadcast %1 : vector<1x24x128xf32> to vector<2x24x128xf32>
    %3 = arith.addf %0, %2 : vector<2x24x128xf32>
    %c0_5 = arith.constant 0 : index
    %c0_6 = arith.constant 0 : index
    %c0_7 = arith.constant 0 : index
    %4 = vector.load %arg2[%c0_5, %c0_6, %c0_7] : memref<2x24x128xf32, #tpu.memory_space<vmem>>, vector<2x24x128xf32>
    tpu.vector_store %arg2[%c0_5, %c0_6, %c0_7], %3 {strides = array<i32>} : memref<2x24x128xf32, #tpu.memory_space<vmem>>, vector<2x24x128xf32>,
    return
  }
}

</mosaic_0001>

<bundles_post_ra>
// kernel: tpu_custom_call.1
= control target key start
LH: loop header
LB: loop body
LE: loop exit
PB: predicated region body
PF: predicated region fallthrough
CT: control target
= control target key end

     0   :  { %7 = vsyncpa [#allocation3], 0  ;;  %s221_s0 = inlined_call_operand.hbm [shape: f32[2,24,128], index: 0, kind: input, shape index: {}]   ;;  %s222_s1 = inlined_call_operand.hbm [shape: f32[1,24,128], index: 1, kind: input, shape index: {}]   ;;  %s223_s2 = inlined_call_operand.hbm [shape: f32[2,24,128], index: 2, kind: output, shape index: {}]  }
   0x1   :  { %8 = vsyncpa [#allocation6], 0 }
   0x2   :  { %9 = vsyncpa [#allocation4], 0  ;;  %s156_s9 = smov [#allocation2]   ;;  %s84_s13 = scalar_lea.hbm %s221_s0, 768 }
   0x3   :  { %s15_s10 = sshll.u32 %s156_s9, 4  ;;  %p85_p0 = scmp.ne.s32.totalorder %s221_s0, %s84_s13  ;;  %s16_s10 = int_to_ptr.vmem [resolvable:$true] %s15_s10 }
   0x4   :  { %p88_p1 = scmp.lt.u32.totalorder %s84_s13, %s221_s0 }
   0x6   :  { %p90_p2 = pnand %p88_p1, %p85_p0 }
   0x8   :  { %93 = shalt.err (!%p90_p2)
}
   0x9   :  { %s94_s18 = scalar_lea.vmem %s16_s10, 768  ;;  %p99_p4 = scmp.lt.s32.totalorder %s16_s10, %s16_s10 }
   0xa   :  { %p95_p3 = scmp.ne.s32.totalorder %s16_s10, %s94_s18  ;;  %p100_p5 = scmp.lt.s32.totalorder %s94_s18, %s94_s18 }
   0xc   :  { %p101_p6 = por %p100_p5, %p99_p4 }
   0xe   :  { %p102_p7 = pnand %p101_p6, %p95_p3 }
  0x10   :  { %105 = shalt.err (!%p102_p7)
}
  0x11   :  { %s157_s19 = smov 128   ;;  %s158_s20 = smov 8  }
  0x12   :  { %21 = dma.hbm_to_vmem [thread:$0]  %s221_s0, 768, %s16_s10, [#allocation3], %s157_s19, %s157_s19, %s158_s20  }
  0x13   :  { %s159_s23 = smov [#allocation5]   ;;  %s106_s27 = scalar_lea.hbm %s222_s1, 384 }
  0x14   :  { %s27_s24 = sshll.u32 %s159_s23, 4  ;;  %p107_p8 = scmp.ne.s32.totalorder %s222_s1, %s106_s27  ;;  %s28_s24 = int_to_ptr.vmem [resolvable:$true] %s27_s24 }
  0x15   :  { %p110_p9 = scmp.lt.u32.totalorder %s106_s27, %s222_s1 }
  0x17   :  { %p112_p10 = pnand %p110_p9, %p107_p8 }
  0x19   :  { %115 = shalt.err (!%p112_p10)
}
  0x1a   :  { %s116_s4 = scalar_lea.vmem %s28_s24, 384  ;;  %p121_p12 = scmp.lt.s32.totalorder %s28_s24, %s28_s24 }
  0x1b   :  { %p117_p11 = scmp.ne.s32.totalorder %s28_s24, %s116_s4  ;;  %p122_p13 = scmp.lt.s32.totalorder %s116_s4, %s116_s4 }
  0x1d   :  { %p123_p0 = por %p122_p13, %p121_p12 }
  0x1f   :  { %p124_p1 = pnand %p123_p0, %p117_p11 }
  0x21   :  { %127 = shalt.err (!%p124_p1)
}
  0x22   :  { %33 = dma.hbm_to_vmem [thread:$0]  %s222_s1, 384, %s28_s24, [#allocation6], %s157_s19, %s157_s19, %s158_s20  }
  0x23   :  { %150 = dma.done.wait [#allocation3], 768  }
  0x24   :  { %151 = vsyncadd [#allocation3], 4294966528 }
  0x25   :  { %152 = dma.done.wait [#allocation6], 384  }
  0x26   :  { %153 = vsyncadd [#allocation6], 4294966912  ;;  %v40_v0 = vld [vmem:[#allocation2] sm:$0xff]  ;;  %v46_v1 = vld [vmem:[#allocation5] sm:$0xff]  ;;  %s160_s6 = smov [#allocation7]  }
  0x27   :  { %v41_v2 = vld [vmem:[#allocation2 + $0x8] sm:$0xff]  ;;  %s66_s7 = sshll.u32 %s160_s6, 4  ;;  %v49_v3 = vadd.f32 %v46_v1, %v40_v0  ;;  %v47_v4 = vld [vmem:[#allocation5 + $0x8] sm:$0xff]  ;;  %v42_v5 = vld [vmem:[#allocation2 + $0x10] sm:$0xff]  ;;  %s67_s7 = int_to_ptr.vmem [resolvable:$true] %s66_s7 }
  0x28   :  { %v48_v6 = vld [vmem:[#allocation5 + $0x10] sm:$0xff]  ;;  %v50_v7 = vadd.f32 %v47_v4, %v41_v2  ;;  %v43_v9 = vld [vmem:[#allocation2 + $0x18] sm:$0xff]  ;;  %v45_v11 = vld [vmem:[#allocation2 + $0x28] sm:$0xff]  ;;  %s128_s1 = scalar_lea.vmem %s67_s7, 768  ;;  %p133_p3 = scmp.lt.s32.totalorder %s67_s7, %s67_s7 }
  0x29   :  { %v51_v8 = vadd.f32 %v48_v6, %v42_v5  ;;  %v44_v10 = vld [vmem:[#allocation2 + $0x20] sm:$0xff]  ;;  %55 = vst [vmem:[#allocation7] sm:$0xff] %v49_v3  ;;  %v52_v12 = vadd.f32 %v46_v1, %v43_v9  ;;  %v54_v14 = vadd.f32 %v48_v6, %v45_v11  ;;  %p129_p2 = scmp.ne.s32.totalorder %s67_s7, %s128_s1  ;;  %p134_p4 = scmp.lt.s32.totalorder %s128_s1, %s128_s1 }
  0x2a   :  { %v53_v13 = vadd.f32 %v47_v4, %v44_v10  ;;  %56 = vst [vmem:[#allocation7 + $0x8] sm:$0xff] %v50_v7 }
  0x2b   :  { %57 = vst [vmem:[#allocation7 + $0x10] sm:$0xff] %v51_v8  ;;  %58 = vst [vmem:[#allocation7 + $0x18] sm:$0xff] %v52_v12  ;;  %p135_p5 = por %p134_p4, %p133_p3 }
  0x2c   :  { %59 = vst [vmem:[#allocation7 + $0x20] sm:$0xff] %v53_v13  ;;  %60 = vst [vmem:[#allocation7 + $0x28] sm:$0xff] %v54_v14 }
  0x2d   :  { %p136_p6 = pnand %p135_p5, %p129_p2 }
  0x2f   :  { %139 = shalt.err (!%p136_p6)
}
  0x30   :  { %s140_s10 = scalar_lea.hbm %s223_s2, 768 }
  0x31   :  { %p141_p7 = scmp.ne.s32.totalorder %s223_s2, %s140_s10  ;;  %p144_p8 = scmp.lt.u32.totalorder %s140_s10, %s223_s2 }
  0x33   :  { %p146_p9 = pnand %p144_p8, %p141_p7 }
  0x35   :  { %149 = shalt.err (!%p146_p9)
}
  0x36   :  { %72 = dma.vmem_to_hbm [thread:$0]  %s67_s7, 768, %s223_s2, [#allocation4], %s157_s19, %s157_s19, %s158_s20  }
  0x37   :  { %154 = dma.done.wait [#allocation4], 768  }
  0x38   :  { %155 = vsyncadd [#allocation4], 4294966528 }
  0x39   :  { %76 = vsyncpa [#allocation3], 1 }
  0x3a   :  { %77 = vsyncpa [#allocation6], 1 }
  0x3b   :  { %78 = vsyncpa [#allocation4], 1 }

</bundles_post_ra>
